<compile_context>
chip_gen: v7x
topology: tpu7x:2x2x1
jax: 0.10.0
libtpu: 0.0.40
codegen_flags: <defaults>
</compile_context>

<pallas_src>
import jax
import jax.numpy as jnp
from jax.experimental import pallas as pl
from jax.experimental.pallas import tpu as pltpu


def temporal_attention_kernel(x_ref, w_attn_ref, b_attn_ref, w_fc_ref, b_fc_ref,
                              out_ref, num_acc, den_acc):
    # x_ref:      (bB, tT, C) VMEM, native dtype (f32 or bf16)
    # w_attn_ref: (1, C)      VMEM, folded conv weight  (w / 64), f32
    # b_attn_ref: (1,)        SMEM, folded conv bias    (b - 2*sum(w))
    # w_fc_ref:   (C, NCp)    VMEM, folded fc weight    (W^T / 64, zero-padded to lanes)
    # b_fc_ref:   (1, NCp)    VMEM, folded fc bias      (b - 2*W.sum(1), zero-padded)
    # out_ref:    (bB, NCp)   VMEM, f32
    # num_acc:    (bB, C)     VMEM f32 scratch (running sum_t x * a)
    # den_acc:    (bB, 1)     VMEM f32 scratch (running sum_t a)
    t = pl.program_id(1)

    @pl.when(t == 0)
    def _init():
        num_acc[...] = jnp.zeros_like(num_acc)
        den_acc[...] = jnp.zeros_like(den_acc)

    x = x_ref[...]  # native dtype; promotes to f32 where used (f32 accumulation)

    # Conv1d(C, 1, k=1) logits: VPU broadcast-multiply + lane (XLU) reduction.
    # (v7x note: if profiling ever shows VALU as the binding slot with bf16 inputs,
    #  this can move to the idle MXU as a (bB*tT, C) x (C, 1) matmul; on v5e/v6e the
    #  kernel is HBM-bound so the VPU/XLU form is the right one.)
    logits = jnp.sum(x * w_attn_ref[...], axis=-1, keepdims=True) + b_attn_ref[0]
    attn = jax.nn.sigmoid(logits)                      # (bB, tT, 1) f32

    # Streamed attention-weighted temporal pooling (the /64-2 affine is folded into
    # the parameters, so x is consumed raw).
    num_acc[...] += jnp.sum(x * attn, axis=1)          # (bB, C) f32
    den_acc[...] += jnp.sum(attn, axis=1)              # (bB, 1) f32, sigmoid => > 0

    @pl.when(t == pl.num_programs(1) - 1)
    def _finalize():
        pooled = num_acc[...] / den_acc[...]           # exact divide (tiny operand)
        y = jnp.dot(pooled, w_fc_ref[...],
                    preferred_element_type=jnp.float32,
                    precision=jax.lax.Precision.HIGHEST) + b_fc_ref[...]
        out_ref[...] = y.astype(out_ref.dtype)


def _vmem_capacity_bytes():
    """Generation-aware VMEM capacity (64 MiB on v7x, 128 MiB on v5e/v6e)."""
    try:
        return int(getattr(pltpu.get_tpu_info(), "vmem_capacity_bytes", 64 << 20))
    except Exception:
        return 64 << 20  # conservative default (v7x per-TensorCore VMEM)


def _choose_tiles(B, T, C, itemsize, vmem_cap):
    """Pick (bB, tT). Per-grid-step VMEM ~ 2*blk*itemsize (double-buffered x) +
    2*blk*4 (in-kernel f32 temporaries x*w and x*attn), with blk = bB*tT*C."""
    budget = int(0.6 * vmem_cap)
    bytes_per_row = C * (2 * itemsize + 8)
    max_rows = max(budget // max(bytes_per_row, 1), 8)

    # T chunk: whole T when it fits; else the largest multiple-of-8 divisor of T.
    if T <= max_rows:
        tT = T
    else:
        divs = [d for d in range(8, T, 8) if T % d == 0 and d <= max_rows]
        tT = max(divs) if divs else T

    # Batch chunk.
    max_b = max(max_rows // tT, 1)
    if B >= 16:
        # Keep >=2 (ideally >=4) batch grid steps so megacore parts (v7x) can shard
        # the "parallel" batch axis across both TensorCores.
        max_b = min(max_b, max(8, (pl.cdiv(B, 4) // 8) * 8))
    if B <= max_b:
        bB = B                             # block == full batch dim: always legal
    else:
        bB = max((max_b // 8) * 8, 8)      # sublane-aligned partial batch block
    return bB, tT


def temporal_attention_bias_action(x, length, w_attn, b_attn, w_fc, b_fc, *,
                                   block_b=None, block_t=None):
    """x: (B, T, C); length: (B,) — unused (parity with the PyTorch forward)."""
    del length  # only cast to float in the reference forward; never consumed
    B, T, C = x.shape
    NC = w_fc.shape[0]
    NCp = ((NC + 127) // 128) * 128  # lane-dense fc output width

    # ---- fold `x/64 - 2` into the parameters (plain-JAX glue, runs once) ----
    #   logits = x @ (w/64) + (b - 2*sum(w))
    #   y      = (sum_t(x*a)/sum_t(a)) @ (W^T/64) + (b_fc - 2*W.sum(axis=1))
    w_a = w_attn.reshape(C).astype(jnp.float32)
    w_attn_f = (w_a / 64.0).reshape(1, C)                                   # (1, C)
    b_attn_f = jnp.reshape(
        b_attn.astype(jnp.float32).reshape(()) - 2.0 * jnp.sum(w_a), (1,))  # (1,)

    w_fc32 = w_fc.astype(jnp.float32)                                       # (NC, C)
    w_fc_f = jnp.transpose(w_fc32) / 64.0                                   # (C, NC)
    b_fc_f = b_fc.astype(jnp.float32) - 2.0 * jnp.sum(w_fc32, axis=1)       # (NC,)
    if NCp != NC:
        w_fc_f = jnp.pad(w_fc_f, ((0, 0), (0, NCp - NC)))
        b_fc_f = jnp.pad(b_fc_f, (0, NCp - NC))
    b_fc_f = b_fc_f.reshape(1, NCp)

    # ---- generation-aware tiling ----
    itemsize = jnp.dtype(x.dtype).itemsize
    vmem_cap = _vmem_capacity_bytes()
    bB, tT = _choose_tiles(B, T, C, itemsize, vmem_cap)
    if block_b is not None:
        bB = block_b
    if block_t is not None:
        tT = block_t

    # Pad batch to a multiple of the batch block (padded rows are sliced off; the
    # sigmoid keeps den > 0 on all-zero rows, so no NaNs/Infs leak in).
    Bp = pl.cdiv(B, bB) * bB
    if Bp != B:
        x = jnp.pad(x, ((0, Bp - B), (0, 0), (0, 0)))
    assert T % tT == 0, "T chunk must divide T (padding T would change the pooling)"
    grid = (Bp // bB, T // tT)

    # ---- VMEM accounting (now includes the in-kernel f32 temporaries) ----
    x_blk = bB * tT * C * itemsize
    temps = 2 * bB * tT * C * 4                   # x*w_attn and x*attn f32 values
    out_blk = bB * NCp * 4
    params = (C * NCp + C + NCp) * 4
    scratch = bB * (C + 1) * 4
    vmem_limit = 2 * x_blk + temps + 2 * out_blk + 2 * params + scratch + (4 << 20)
    vmem_cap_lim = max(int(0.75 * vmem_cap), 32 << 20)
    vmem_limit = int(min(max(vmem_limit, 16 << 20), vmem_cap_lim))

    cost = pl.CostEstimate(
        flops=int(4 * Bp * T * C + 2 * Bp * C * NCp),
        transcendentals=int(Bp * T),
        bytes_accessed=int(Bp * T * C * itemsize + Bp * NCp * 4 + params),
    )

    out = pl.pallas_call(
        temporal_attention_kernel,
        out_shape=jax.ShapeDtypeStruct((Bp, NCp), jnp.float32),
        grid=grid,
        in_specs=[
            pl.BlockSpec((bB, tT, C), lambda i, t: (i, t, 0)),      # x (pipelined)
            pl.BlockSpec((1, C), lambda i, t: (0, 0)),              # folded conv weight
            pl.BlockSpec(memory_space=pltpu.MemorySpace.SMEM),      # folded conv bias
            pl.BlockSpec((C, NCp), lambda i, t: (0, 0)),            # folded fc weight
            pl.BlockSpec((1, NCp), lambda i, t: (0, 0)),            # folded fc bias
        ],
        out_specs=pl.BlockSpec((bB, NCp), lambda i, t: (i, 0)),
        scratch_shapes=[
            pltpu.VMEM((bB, C), jnp.float32),   # num accumulator
            pltpu.VMEM((bB, 1), jnp.float32),   # den accumulator
        ],
        compiler_params=pltpu.CompilerParams(
            dimension_semantics=("parallel", "arbitrary"),
            vmem_limit_bytes=vmem_limit,
        ),
        cost_estimate=cost,
    )(x, w_attn_f, b_attn_f, w_fc_f, b_fc_f)

    return out[:B, :NC]


def _reference(x, w_attn, b_attn, w_fc, b_fc):
    """Pure-JAX f32 mirror of the PyTorch forward (highest matmul precision so it
    is a true f32 reference even on TPU, which demotes default-precision dots)."""
    out = x.astype(jnp.float32) / 64.0 - 2.0                       # (B, T, C)
    logits = jnp.einsum("btc,c->bt", out, w_attn.reshape(-1).astype(jnp.float32),
                        precision=jax.lax.Precision.HIGHEST)
    logits = logits + b_attn.astype(jnp.float32).reshape(())
    attn = jax.nn.sigmoid(logits)[..., None]                       # (B, T, 1)
    pooled = jnp.sum(out * attn, axis=1) / jnp.sum(attn, axis=1)
    return (jnp.dot(pooled, w_fc.astype(jnp.float32).T,
                    precision=jax.lax.Precision.HIGHEST)
            + b_fc.astype(jnp.float32))


if __name__ == "__main__":
    # Small shapes consistent with the module: data_length=[96, 32] -> C=128,
    # class_length=[29, 64] -> num_classes=64, batch=2, seq T=8.
    B, T, C, NC = 2, 8, 128, 64

    key = jax.random.PRNGKey(0)
    kx, kw1, kb1, kw2, kb2 = jax.random.split(key, 5)

    # inputs (raw-feature-like range; the forward rescales by /64 - 2)
    x = jax.random.uniform(kx, (B, T, C), jnp.float32, minval=0.0, maxval=255.0)
    length = jnp.full((B,), T, dtype=jnp.int32)

    # deterministic parameter init (PyTorch-default-style uniform bounds)
    bound = 1.0 / jnp.sqrt(jnp.float32(C))
    w_attn = jax.random.uniform(kw1, (1, C, 1), jnp.float32, -bound, bound)  # Conv1d weight
    b_attn = jax.random.uniform(kb1, (1,), jnp.float32, -bound, bound)       # Conv1d bias
    w_fc = jax.random.uniform(kw2, (NC, C), jnp.float32, -bound, bound)      # Linear weight
    b_fc = jax.random.uniform(kb2, (NC,), jnp.float32, -bound, bound)        # Linear bias

    y = temporal_attention_bias_action(x, length, w_attn, b_attn, w_fc, b_fc)
    y = jax.block_until_ready(y)

    y_ref = _reference(x, w_attn, b_attn, w_fc, b_fc)
    assert y.shape == (B, NC)
    # Exact division + HIGHEST-precision matmuls on both sides: the remaining
    # difference is accumulation order only (~1e-5); 2e-3 leaves ample headroom.
    assert jnp.allclose(y, y_ref, atol=2e-3, rtol=2e-3), "mismatch vs reference"

    print("KERNEL_OK")
</pallas_src>

<mosaic_0001>
module attributes {stable_mosaic.version = 11 : i64} {
  func.func @temporal_attention_kernel(%arg0: i32, %arg1: i32, %arg2: memref<2x8x128xf32, #tpu.memory_space<vmem>>, %arg3: memref<1x128xf32, #tpu.memory_space<vmem>>, %arg4: memref<1xf32, #tpu.memory_space<smem>>, %arg5: memref<128x128xf32, #tpu.memory_space<vmem>>, %arg6: memref<1x128xf32, #tpu.memory_space<vmem>>, %arg7: memref<2x128xf32, #tpu.memory_space<vmem>>, %arg8: memref<2x128xf32, #tpu.memory_space<vmem>>, %arg9: memref<2x1xf32, #tpu.memory_space<vmem>>) attributes {dimension_semantics = [#tpu.dimension_semantics<parallel>, #tpu.dimension_semantics<arbitrary>], iteration_bounds = array<i64: 1, 1>, scalar_prefetch = 0 : i64, scratch_operands = 2 : i64, tpu.core_type = #tpu.core_type<tc>, window_params = [{transform_indices = @transform_0, window_bounds = array<i64: 2, 8, 128>}, {pipeline_mode = #tpu.pipeline_mode<synchronous>, transform_indices = @transform_1, window_bounds = array<i64: 1, 128>}, {transform_indices = @transform_2, window_bounds = array<i64: 1>}, {pipeline_mode = #tpu.pipeline_mode<synchronous>, transform_indices = @transform_3, window_bounds = array<i64: 128, 128>}, {pipeline_mode = #tpu.pipeline_mode<synchronous>, transform_indices = @transform_4, window_bounds = array<i64: 1, 128>}, {transform_indices = @transform_5, window_bounds = array<i64: 2, 128>}]} {
    %c0_i32 = arith.constant 0 : i32
    %0 = arith.cmpi eq, %arg1, %c0_i32 : i32
    %1 = arith.extui %0 : i1 to i32
    %c0_i32_0 = arith.constant 0 : i32
    %2 = arith.cmpi ne, %1, %c0_i32_0 : i32
    scf.if %2 {
      %cst_19 = arith.constant 0.000000e+00 : f32
      %31 = vector.broadcast %cst_19 : f32 to vector<2x128xf32>
      %c0_20 = arith.constant 0 : index
      %c0_21 = arith.constant 0 : index
      %32 = vector.load %arg8[%c0_20, %c0_21] : memref<2x128xf32, #tpu.memory_space<vmem>>, vector<2x128xf32>
      tpu.vector_store %arg8[%c0_20, %c0_21], %31 {strides = array<i32>} : memref<2x128xf32, #tpu.memory_space<vmem>>, vector<2x128xf32>,
      %cst_22 = arith.constant 0.000000e+00 : f32
      %33 = vector.broadcast %cst_22 : f32 to vector<2x1xf32>
      %c0_23 = arith.constant 0 : index
      %c0_24 = arith.constant 0 : index
      %34 = vector.load %arg9[%c0_23, %c0_24] : memref<2x1xf32, #tpu.memory_space<vmem>>, vector<2x1xf32>
      tpu.vector_store %arg9[%c0_23, %c0_24], %33 {strides = array<i32>} : memref<2x1xf32, #tpu.memory_space<vmem>>, vector<2x1xf32>,
    } else {
    }
    %c0 = arith.constant 0 : index
    %c0_1 = arith.constant 0 : index
    %c0_2 = arith.constant 0 : index
    %3 = vector.load %arg2[%c0, %c0_1, %c0_2] : memref<2x8x128xf32, #tpu.memory_space<vmem>>, vector<2x8x128xf32>
    %c0_3 = arith.constant 0 : index
    %c0_4 = arith.constant 0 : index
    %4 = vector.load %arg3[%c0_3, %c0_4] : memref<1x128xf32, #tpu.memory_space<vmem>>, vector<1x128xf32>
    %5 = vector.shape_cast %4 : vector<1x128xf32> to vector<1x1x128xf32>
    %6 = vector.broadcast %5 : vector<1x1x128xf32> to vector<2x8x128xf32>
    %7 = arith.mulf %3, %6 : vector<2x8x128xf32>
    %cst = arith.constant dense<0.000000e+00> : vector<2x8xf32>
    %8 = vector.multi_reduction <add>, %7, %cst [2] : vector<2x8x128xf32> to vector<2x8xf32>
    %9 = vector.shape_cast %8 : vector<2x8xf32> to vector<2x8x1xf32>
    %c0_5 = arith.constant 0 : index
    %10 = memref.load %arg4[%c0_5] : memref<1xf32, #tpu.memory_space<smem>>
    %11 = vector.broadcast %10 : f32 to vector<2x8x1xf32>
    %12 = arith.addf %9, %11 : vector<2x8x1xf32>
    %13 = arith.negf %12 : vector<2x8x1xf32>
    %14 = math.exp %13 : vector<2x8x1xf32>
    %cst_6 = arith.constant 1.000000e+00 : f32
    %15 = vector.broadcast %cst_6 : f32 to vector<2x8x1xf32>
    %16 = arith.addf %15, %14 : vector<2x8x1xf32>
    %17 = arith.divf %15, %16 : vector<2x8x1xf32>
    %c0_7 = arith.constant 0 : index
    %c0_8 = arith.constant 0 : index
    %18 = vector.load %arg8[%c0_7, %c0_8] : memref<2x128xf32, #tpu.memory_space<vmem>>, vector<2x128xf32>
    %19 = vector.broadcast %17 : vector<2x8x1xf32> to vector<2x8x128xf32>
    %20 = arith.mulf %3, %19 : vector<2x8x128xf32>
    %cst_9 = arith.constant dense<0.000000e+00> : vector<2x128xf32>
    %21 = vector.multi_reduction <add>, %20, %cst_9 [1] : vector<2x8x128xf32> to vector<2x128xf32>
    %22 = arith.addf %18, %21 : vector<2x128xf32>
    %c0_10 = arith.constant 0 : index
    %c0_11 = arith.constant 0 : index
    %23 = vector.load %arg8[%c0_10, %c0_11] : memref<2x128xf32, #tpu.memory_space<vmem>>, vector<2x128xf32>
    tpu.vector_store %arg8[%c0_10, %c0_11], %22 {strides = array<i32>} : memref<2x128xf32, #tpu.memory_space<vmem>>, vector<2x128xf32>,
    %c0_12 = arith.constant 0 : index
    %c0_13 = arith.constant 0 : index
    %24 = vector.load %arg9[%c0_12, %c0_13] : memref<2x1xf32, #tpu.memory_space<vmem>>, vector<2x1xf32>
    %cst_14 = arith.constant dense<0.000000e+00> : vector<2x1xf32>
    %25 = vector.multi_reduction <add>, %17, %cst_14 [1] : vector<2x8x1xf32> to vector<2x1xf32>
    %26 = arith.addf %24, %25 : vector<2x1xf32>
    %c0_15 = arith.constant 0 : index
    %c0_16 = arith.constant 0 : index
    %27 = vector.load %arg9[%c0_15, %c0_16] : memref<2x1xf32, #tpu.memory_space<vmem>>, vector<2x1xf32>
    tpu.vector_store %arg9[%c0_15, %c0_16], %26 {strides = array<i32>} : memref<2x1xf32, #tpu.memory_space<vmem>>, vector<2x1xf32>,
    %c0_i32_17 = arith.constant 0 : i32
    %28 = arith.cmpi eq, %arg1, %c0_i32_17 : i32
    %29 = arith.extui %28 : i1 to i32
    %c0_i32_18 = arith.constant 0 : i32
    %30 = arith.cmpi ne, %29, %c0_i32_18 : i32
    scf.if %30 {
      %c0_19 = arith.constant 0 : index
      %c0_20 = arith.constant 0 : index
      %31 = vector.load %arg8[%c0_19, %c0_20] : memref<2x128xf32, #tpu.memory_space<vmem>>, vector<2x128xf32>
      %c0_21 = arith.constant 0 : index
      %c0_22 = arith.constant 0 : index
      %32 = vector.load %arg9[%c0_21, %c0_22] : memref<2x1xf32, #tpu.memory_space<vmem>>, vector<2x1xf32>
      %33 = vector.broadcast %32 : vector<2x1xf32> to vector<2x128xf32>
      %34 = arith.divf %31, %33 : vector<2x128xf32>
      %c0_23 = arith.constant 0 : index
      %c0_24 = arith.constant 0 : index
      %35 = vector.load %arg5[%c0_23, %c0_24] : memref<128x128xf32, #tpu.memory_space<vmem>>, vector<128x128xf32>
      %cst_25 = arith.constant dense<0.000000e+00> : vector<2x128xf32>
      %36 = tpu.matmul %34, %35, %cst_25 {dimension_numbers = #tpu.dot_dimension_numbers<[1], [0], [0], [1], [0, 0, 1, 1], [], []>, precision = #tpu.contract_precision<fp32>} : vector<2x128xf32>, vector<128x128xf32>, vector<2x128xf32> -> vector<2x128xf32>
      %c0_26 = arith.constant 0 : index
      %c0_27 = arith.constant 0 : index
      %37 = vector.load %arg6[%c0_26, %c0_27] : memref<1x128xf32, #tpu.memory_space<vmem>>, vector<1x128xf32>
      %38 = vector.broadcast %37 : vector<1x128xf32> to vector<2x128xf32>
      %39 = arith.addf %36, %38 : vector<2x128xf32>
      %c0_28 = arith.constant 0 : index
      %c0_29 = arith.constant 0 : index
      %40 = vector.load %arg7[%c0_28, %c0_29] : memref<2x128xf32, #tpu.memory_space<vmem>>, vector<2x128xf32>
      tpu.vector_store %arg7[%c0_28, %c0_29], %39 {strides = array<i32>} : memref<2x128xf32, #tpu.memory_space<vmem>>, vector<2x128xf32>,
    } else {
    }
    return
  }
  func.func @transform_0(%arg0: i32, %arg1: i32) -> (i32, i32, i32) {
    %c0_i32 = arith.constant 0 : i32
    %c0_i32_0 = arith.constant 0 : i32
    return %arg0, %arg1, %c0_i32 : i32, i32, i32
  }
  func.func @transform_1(%arg0: i32, %arg1: i32) -> (i32, i32) {
    %c0_i32 = arith.constant 0 : i32
    %c0_i32_0 = arith.constant 0 : i32
    %c0_i32_1 = arith.constant 0 : i32
    return %c0_i32, %c0_i32_0 : i32, i32
  }
  func.func @transform_2(%arg0: i32, %arg1: i32) -> i32 {
    %c0_i32 = arith.constant 0 : i32
    %c0_i32_0 = arith.constant 0 : i32
    return %c0_i32 : i32
  }
  func.func @transform_3(%arg0: i32, %arg1: i32) -> (i32, i32) {
    %c0_i32 = arith.constant 0 : i32
    %c0_i32_0 = arith.constant 0 : i32
    %c0_i32_1 = arith.constant 0 : i32
    return %c0_i32, %c0_i32_0 : i32, i32
  }
  func.func @transform_4(%arg0: i32, %arg1: i32) -> (i32, i32) {
    %c0_i32 = arith.constant 0 : i32
    %c0_i32_0 = arith.constant 0 : i32
    %c0_i32_1 = arith.constant 0 : i32
    return %c0_i32, %c0_i32_0 : i32, i32
  }
  func.func @transform_5(%arg0: i32, %arg1: i32) -> (i32, i32) {
    %c0_i32 = arith.constant 0 : i32
    %c0_i32_0 = arith.constant 0 : i32
    return %arg0, %c0_i32 : i32, i32
  }
}

</mosaic_0001>

<bundles_post_ra>
// kernel: tpu_custom_call.1
= control target key start
LH: loop header
LB: loop body
LE: loop exit
PB: predicated region body
PF: predicated region fallthrough
CT: control target
= control target key end

     0   :  { %11 = vsyncpa [#allocation6], 0  ;;  %s1721_s0 = inlined_call_operand.hbm [shape: f32[2,8,128], index: 0, kind: input, shape index: {}]   ;;  %s1722_s1 = inlined_call_operand.vmem [shape: f32[1,128], index: 1, kind: input, shape index: {}]   ;;  %s1723_s2 = inlined_call_operand.<no memory space> [shape: f32[1], index: 2, kind: input, shape index: {}]   ;;  %s1724_s3 = inlined_call_operand.hbm [shape: f32[128,128], index: 3, kind: input, shape index: {}]   ;;  %s1725_s4 = inlined_call_operand.vmem [shape: f32[1,128], index: 4, kind: input, shape index: {}]   ;;  %s1726_s5 = inlined_call_operand.hbm [shape: f32[2,128], index: 5, kind: output, shape index: {}]  }
   0x1   :  { %12 = vsyncpa [#allocation9], 0 }
   0x2   :  { %13 = vsyncpa [#allocation7], 0  ;;  %s1386_s18 = smov [#allocation5]   ;;  %s1314_s22 = scalar_lea.hbm %s1721_s0, 256 }
   0x3   :  { %s19_s19 = sshll.u32 %s1386_s18, 4  ;;  %p1315_p0 = scmp.ne.s32.totalorder %s1721_s0, %s1314_s22  ;;  %s20_s19 = int_to_ptr.vmem [resolvable:$true] %s19_s19 }
   0x4   :  { %p1318_p1 = scmp.lt.u32.totalorder %s1314_s22, %s1721_s0 }
   0x6   :  { %p1320_p2 = pnand %p1318_p1, %p1315_p0 }
   0x8   :  { %1323 = shalt.err (!%p1320_p2)
}
   0x9   :  { %s1324_s27 = scalar_lea.vmem %s20_s19, 256  ;;  %p1329_p4 = scmp.lt.s32.totalorder %s20_s19, %s20_s19 }
   0xa   :  { %p1325_p3 = scmp.ne.s32.totalorder %s20_s19, %s1324_s27  ;;  %p1330_p5 = scmp.lt.s32.totalorder %s1324_s27, %s1324_s27 }
   0xc   :  { %p1331_p6 = por %p1330_p5, %p1329_p4 }
   0xe   :  { %p1332_p7 = pnand %p1331_p6, %p1325_p3 }
  0x10   :  { %1335 = shalt.err (!%p1332_p7)
}
  0x11   :  { %s1387_s28 = smov 128   ;;  %s1388_s29 = smov 8  }
  0x12   :  { %25 = dma.hbm_to_vmem [thread:$0]  %s1721_s0, 256, %s20_s19, [#allocation6], %s1387_s28, %s1387_s28, %s1388_s29  }
  0x13   :  { %s1389_s7 = smov [#allocation8]   ;;  %s1336_s11 = scalar_lea.hbm %s1724_s3, 2048 }
  0x14   :  { %s35_s8 = sshll.u32 %s1389_s7, 4  ;;  %p1337_p8 = scmp.ne.s32.totalorder %s1724_s3, %s1336_s11  ;;  %s36_s8 = int_to_ptr.vmem [resolvable:$true] %s35_s8 }
  0x15   :  { %p1340_p9 = scmp.lt.u32.totalorder %s1336_s11, %s1724_s3 }
  0x17   :  { %p1342_p10 = pnand %p1340_p9, %p1337_p8 }
  0x19   :  { %1345 = shalt.err (!%p1342_p10)
}
  0x1a   :  { %s1346_s16 = scalar_lea.vmem %s36_s8, 2048  ;;  %p1351_p12 = scmp.lt.s32.totalorder %s36_s8, %s36_s8 }
  0x1b   :  { %p1347_p11 = scmp.ne.s32.totalorder %s36_s8, %s1346_s16  ;;  %p1352_p13 = scmp.lt.s32.totalorder %s1346_s16, %s1346_s16 }
  0x1d   :  { %p1353_p0 = por %p1352_p13, %p1351_p12 }
  0x1f   :  { %p1354_p1 = pnand %p1353_p0, %p1347_p11 }
  0x21   :  { %1357 = shalt.err (!%p1354_p1)
}
  0x22   :  { %41 = dma.hbm_to_vmem [thread:$0]  %s1724_s3, 2048, %s36_s8, [#allocation9], %s1387_s28, %s1387_s28, %s1388_s29  }
  0x23   :  { %1380 = dma.done.wait [#allocation6], 256  }
  0x24   :  { %1381 = vsyncadd [#allocation6], 4294967040 }
  0x25   :  { %1382 = dma.done.wait [#allocation9], 2048  }
  0x26   :  { %1383 = vsyncadd [#allocation9], 4294965248  ;;  %v1449_v0 = vld [vmem:[#allocation5] sm:$0xff]  ;;  %v823_v1 = vld [vmem:[%s1722_s1] ss:$0 sm:$0xff]  ;;  %vm55_vm0 = vcmask 1024   ;;  %v73_v36 = vstv %s1723_s2 }
  0x27   :  { %v1454_v2 = vld [vmem:[#allocation5 + $0x8] sm:$0xff]  ;;  %v66_v3 = vmul.f32 %v823_v1, %v1449_v0  ;;  %v1390_v5 = vmov 0.0   ;;  %v1391_v6 = vmov 0   ;;  %v142_v7 = vld [vmem:[#allocation8] sm:$0xff]  ;;  %v143_v8 = vld [vmem:[#allocation8 + $0x8] sm:$0xff]  ;;  %v1392_v10 = vmov 0.0|0.0  }
  0x28   :  { %v67_v4 = vmul.f32 %v823_v1, %v1454_v2  ;;  %54 = vst [vmem:[#allocation2] sm:$0x3] %v1390_v5  ;;  %56 = vst.msk [vmem:[#allocation3] sm:$0x3] %vm55_vm0, %v1390_v5  ;;  %1302 = vset.pattern.permute.xlu1 %v1391_v6  ;;  %1303 = vset.pattern.permute.xlu0 %v1391_v6  ;;  %v144_v9 = vld [vmem:[#allocation8 + $0x10] sm:$0xff]  ;;  %v166_v11 = vand.u32 4294901760, %v142_v7 }
  0x29   :  { %68 = vadd.xlane.f32.xlu0 %v66_v3  ;;  %1211 = vmatprep.subr.bf16.mxu0 %v1392_v10  ;;  %v169_v12 = vand.u32 4294901760, %v143_v8  ;;  %v145_v13 = vld [vmem:[#allocation8 + $0x18] sm:$0xff]  ;;  %v172_v14 = vand.u32 4294901760, %v144_v9  ;;  %v146_v15 = vld [vmem:[#allocation8 + $0x20] sm:$0xff]  ;;  %v147_v16 = vld [vmem:[#allocation8 + $0x28] sm:$0xff]  ;;  %vm105_vm1 = vcmask 1041409  }
  0x2a   :  { %1139 = vmatprep.subr.bf16.mxu1 %v1392_v10  ;;  %v175_v17 = vand.u32 4294901760, %v145_v13  ;;  %v178_v18 = vand.u32 4294901760, %v146_v15  ;;  %v181_v19 = vand.u32 4294901760, %v147_v16  ;;  %v148_v20 = vld [vmem:[#allocation8 + $0x30] sm:$0xff]  ;;  %v149_v21 = vld [vmem:[#allocation8 + $0x38] sm:$0xff]  ;;  %v1465_v23 = vsub.f32 %v142_v7, %v166_v11  ;;  %s1394_s21 = smov [#allocation10]  }
  0x2b   :  { %v1463_v22 = vpack.c.bf16 %v169_v12, %v166_v11  ;;  %v1467_v24 = vsub.f32 %v143_v8, %v169_v12  ;;  %v1469_v25 = vsub.f32 %v144_v9, %v172_v14  ;;  %v184_v30 = vand.u32 4294901760, %v148_v20  ;;  %s813_s22 = sshll.u32 %s1394_s21, 4  ;;  %s814_s22 = int_to_ptr.vmem [resolvable:$true] %s813_s22 }
  0x2c   :  { %v1471_v26 = vsub.f32 %v145_v13, %v175_v17  ;;  %v1473_v27 = vsub.f32 %v146_v15, %v178_v18  ;;  %v1477_v28 = vpack.c.bf16 %v175_v17, %v172_v14  ;;  %v1479_v29 = vsub.f32 %v147_v16, %v181_v19  ;;  %s1358_s23 = scalar_lea.vmem %s814_s22, 32  ;;  %p1363_p3 = scmp.lt.s32.totalorder %s814_s22, %s814_s22 }
  0x2d   :  { %70 = vadd.xlane.f32.xlu0 %v67_v4  ;;  %1213 = vmatpush3.bf16.msra.mxu0 %v1463_v22  ;;  %v187_v31 = vand.u32 4294901760, %v149_v21  ;;  %v1483_v32 = vsub.f32 %v148_v20, %v184_v30  ;;  %v1489_v34 = vpack.c.bf16 %v181_v19, %v178_v18  ;;  %v150_v19 = vld [vmem:[#allocation8 + $0x40] sm:$0xff]  ;;  %v151_v20 = vld [vmem:[#allocation8 + $0x48] sm:$0xff]  ;;  %vm1393_vm2 = vmmov 0   ;;  %p1359_p2 = scmp.ne.s32.totalorder %s814_s22, %s1358_s23  ;;  %p1364_p4 = scmp.lt.s32.totalorder %s1358_s23, %s1358_s23 }
  0x2e   :  { %1141 = vmatpush3.bf16.msra.mxu1 %v1463_v22  ;;  %1214 = vmatprep.subr.bf16.mxu0 %v1392_v10 }
  0x2f   :  { %1142 = vmatprep.subr.bf16.mxu1 %v1392_v10  ;;  %v1485_v33 = vsub.f32 %v149_v21, %v187_v31  ;;  %v1495_v35 = vpack.c.bf16 %v187_v31, %v184_v30  ;;  %v110_v12 = vld [vmem:[#allocation3] sm:$0x3]  ;;  %v88_v13 = vld [vmem:[#allocation2] sm:$0x3]  ;;  %v190_v30 = vand.u32 4294901760, %v150_v19  ;;  %v193_v31 = vand.u32 4294901760, %v151_v20  ;;  %1066 = vmatprep.mubr.msk.f32.mxu0 %vm1393_vm2, %v1390_v5  ;;  %p1365_p5 = por %p1364_p4, %p1363_p3 }
  0x30   :  { %961 = vmatprep.mubr.msk.f32.mxu1 %vm1393_vm2, %v1390_v5 }
  0x31   :  { %1216 = vmatpush3.bf16.msra.mxu0 %v1477_v28  ;;  %p1366_p6 = pnand %p1365_p5, %p1359_p2 }
  0x32   :  { %1144 = vmatpush3.bf16.msra.mxu1 %v1477_v28  ;;  %1217 = vmatprep.subr.bf16.mxu0 %v1392_v10 }
  0x33   :  { %1145 = vmatprep.subr.bf16.mxu1 %v1392_v10 }
  0x35   :  { %1219 = vmatpush3.bf16.msra.mxu0 %v1489_v34 }
  0x36   :  { %1147 = vmatpush3.bf16.msra.mxu1 %v1489_v34  ;;  %1220 = vmatprep.subr.bf16.mxu0 %v1392_v10 }
  0x37   :  { %1148 = vmatprep.subr.bf16.mxu1 %v1392_v10 }
  0x39   :  { %1222 = vmatpush3.bf16.msra.mxu0 %v1495_v35 }
  0x3a   :  { %1150 = vmatpush3.bf16.msra.mxu1 %v1495_v35  ;;  %1223 = vmatprep.subr.bf16.mxu0 %v1392_v10 }
  0x3b   :  { %1151 = vmatprep.subr.bf16.mxu1 %v1392_v10 }
  0xb6   :  { %v69_v37 = vpop.xlane.xlu0 %68 }
  0xb7   :  { %v74_v38 = vadd.f32 %v73_v36, %v69_v37  ;;  %v153_v37 = vld [vmem:[#allocation8 + $0x58] sm:$0xff] }
  0xb9   :  { %v824_v39 = vmul.f32 -1.442695, %v74_v38  ;;  %v154_v38 = vld [vmem:[#allocation8 + $0x60] sm:$0xff] }
  0xba   :  { %v71_v40 = vpop.xlane.xlu0 %70 }
  0xbb   :  { %1304 = vpow2.f32 %v824_v39  ;;  %v75_v41 = vadd.f32 %v73_v36, %v71_v40  ;;  %v152_v36 = vld [vmem:[#allocation8 + $0x50] sm:$0xff]  ;;  %v1509_v39 = vpack.c.bf16 %v193_v31, %v190_v30  ;;  %v1511_v40 = vsub.f32 %v150_v19, %v190_v30 }
  0xbc   :  { %v308_v30 = vand.u32 4294901760, %v1485_v33 }
  0xbd   :  { %v825_v42 = vmul.f32 -1.442695, %v75_v41  ;;  %v1513_v41 = vsub.f32 %v151_v20, %v193_v31  ;;  %1225 = vmatpush3.bf16.msra.mxu0 %v1509_v39  ;;  %1153 = vmatpush3.bf16.msra.mxu1 %v1509_v39 }
  0xbe   :  { %1226 = vmatprep.subr.bf16.mxu0 %v1392_v10  ;;  %1154 = vmatprep.subr.bf16.mxu1 %v1392_v10 }
  0xbf   :  { %1306 = vpow2.f32 %v825_v42  ;;  %v196_v42 = vand.u32 4294901760, %v152_v36 }
  0xc5   :  { %v1305_v43 = vpop.eup %1304 }
  0xc6   :  { %v82_v44 = vadd.f32 1.0, %v1305_v43  ;;  %v155_v43 = vld [vmem:[#allocation8 + $0x68] sm:$0xff] }
  0xc8   :  { %1308 = vrcp.f32 %v82_v44  ;;  %v156_v44 = vld [vmem:[#allocation8 + $0x70] sm:$0xff] }
  0xc9   :  { %v1307_v45 = vpop.eup %1306 }
  0xca   :  { %v83_v46 = vadd.f32 1.0, %v1307_v45  ;;  %v157_v45 = vld [vmem:[#allocation8 + $0x78] sm:$0xff] }
  0xcc   :  { %1310 = vrcp.f32 %v83_v46  ;;  %v199_v46 = vand.u32 4294901760, %v153_v37 }
  0xd2   :  { %v1309_v47 = vpop.eup %1308 }
  0xd3   :  { %v89_v48 = vmul.f32 %v1309_v47, %v1449_v0  ;;  %v111_v49 = vrot.slane %v1309_v47, 4 }
  0xd5   :  { %v91_v50 = vrot.slane %v89_v48, 4  ;;  %v112_v51 = vadd.f32 %v1309_v47, %v111_v49  ;;  %v1521_v47 = vsub.f32 %v152_v36, %v196_v42  ;;  %v205_v49 = vand.u32 4294901760, %v155_v43 }
  0xd6   :  { %v1311_v52 = vpop.eup %1310 }
  0xd7   :  { %v92_v53 = vadd.f32 %v91_v50, %v89_v48  ;;  %v113_v54 = vrot.slane %v112_v51, 2  ;;  %v90_v55 = vmul.f32 %v1311_v52, %v1454_v2  ;;  %v117_v56 = vrot.slane %v1311_v52, 4 }
  0xd8   :  { %v202_v48 = vand.u32 4294901760, %v154_v38  ;;  %v208_v50 = vand.u32 4294901760, %v156_v44 }
  0xd9   :  { %v93_v57 = vrot.slane %v92_v53, 2  ;;  %v114_v58 = vadd.f32 %v113_v54, %v112_v51  ;;  %v97_v59 = vrot.slane %v90_v55, 4  ;;  %v118_v60 = vadd.f32 %v1311_v52, %v117_v56 }
  0xda   :  { %v1524_v51 = vpack.c.bf16 %v199_v46, %v196_v42  ;;  %v1526_v52 = vsub.f32 %v153_v37, %v199_v46  ;;  %v1529_v54 = vsub.f32 %v154_v38, %v202_v48  ;;  %v1533_v56 = vsub.f32 %v156_v44, %v208_v50 }
  0xdb   :  { %v94_v61 = vadd.f32 %v93_v57, %v92_v53  ;;  %v98_v62 = vadd.f32 %v97_v59, %v90_v55  ;;  %v119_v63 = vrot.slane %v118_v60, 2  ;;  %v115_v1 = vrot.slane %v114_v58, 1 }
  0xdc   :  { %v211_v53 = vand.u32 4294901760, %v157_v45  ;;  %v1531_v55 = vsub.f32 %v155_v43, %v205_v49  ;;  %1228 = vmatpush3.bf16.msra.mxu0 %v1524_v51  ;;  %1156 = vmatpush3.bf16.msra.mxu1 %v1524_v51  ;;  %v309_v38 = vsub.f32 %v1485_v33, %v308_v30  ;;  %v315_v44 = vand.u32 4294901760, %v1511_v40 }
  0xdd   :  { %v99_v3 = vrot.slane %v98_v62, 2  ;;  %v120_v4 = vadd.f32 %v119_v63, %v118_v60  ;;  %v95_v0 = vrot.slane %v94_v61, 1  ;;  %v116_v8 = vadd.f32 %v115_v1, %v114_v58  ;;  %1229 = vmatprep.subr.bf16.mxu0 %v1392_v10  ;;  %1157 = vmatprep.subr.bf16.mxu1 %v1392_v10 }
  0xde   :  { %v1535_v57 = vsub.f32 %v157_v45, %v211_v53  ;;  %v1539_v58 = vpack.c.bf16 %v205_v49, %v202_v48  ;;  %v1545_v59 = vpack.c.bf16 %v211_v53, %v208_v50  ;;  %v259_v60 = vand.u32 4294901760, %v1465_v23 }
  0xdf   :  { %v100_v6 = vadd.f32 %v99_v3, %v98_v62  ;;  %v121_v7 = vrot.slane %v120_v4, 1  ;;  %v96_v2 = vadd.f32 %v95_v0, %v94_v61  ;;  %v266_v61 = vand.u32 4294901760, %v1467_v24 }
  0xe0   :  { %1231 = vmatpush3.bf16.msra.mxu0 %v1539_v58  ;;  %1159 = vmatpush3.bf16.msra.mxu1 %v1539_v58  ;;  %v260_v63 = vsub.f32 %v1465_v23, %v259_v60  ;;  %v273_v0 = vand.u32 4294901760, %v1469_v25  ;;  %v310_v43 = vand.u32 4294901760, %v309_v38  ;;  %v322_v45 = vand.u32 4294901760, %v1513_v41 }
  0xe1   :  { %v101_v9 = vrot.slane %v100_v6, 1  ;;  %v122_v11 = vadd.f32 %v121_v7, %v120_v4  ;;  %1232 = vmatprep.subr.bf16.mxu0 %v1392_v10  ;;  %1160 = vmatprep.subr.bf16.mxu1 %v1392_v10  ;;  %v1555_v62 = vpack.c.bf16 %v266_v61, %v259_v60  ;;  %v267_v1 = vsub.f32 %v1467_v24, %v266_v61 }
  0xe2   :  { %v261_v3 = vand.u32 4294901760, %v260_v63  ;;  %v1587_v48 = vpack.c.bf16 %v322_v45, %v315_v44  ;;  %v316_v49 = vsub.f32 %v1511_v40, %v315_v44  ;;  %v323_v50 = vsub.f32 %v1513_v41, %v322_v45 }
  0xe3   :  { %v102_v14 = vadd.f32 %v101_v9, %v100_v6  ;;  %v125_v15 = vsel %vm105_vm1, %v122_v11, %v116_v8  ;;  %v268_v4 = vand.u32 4294901760, %v267_v1  ;;  %v280_v6 = vand.u32 4294901760, %v1471_v26 }
  0xe4   :  { %v127_v16 = vadd.f32 %v125_v15, %v110_v12  ;;  %1234 = vmatpush3.bf16.msra.mxu0 %v1545_v59  ;;  %1162 = vmatpush3.bf16.msra.mxu1 %v1545_v59  ;;  %v274_v9 = vsub.f32 %v1469_v25, %v273_v0  ;;  %v317_v53 = vand.u32 4294901760, %v316_v49  ;;  %v324_v60 = vand.u32 4294901760, %v323_v50 }
  0xe5   :  { %v106_v17 = vsel %vm105_vm1, %v102_v14, %v96_v2  ;;  %1235 = vmatprep.subr.bf16.mxu0 %v1392_v10  ;;  %1163 = vmatprep.subr.bf16.mxu1 %v1392_v10  ;;  %v1561_v7 = vpack.c.bf16 %v268_v4, %v261_v3  ;;  %v1563_v8 = vpack.c.bf16 %v280_v6, %v273_v0  ;;  %v294_v14 = vand.u32 4294901760, %v1479_v29 }
  0xe6   :  { %v108_v18 = vadd.f32 %v106_v17, %v88_v13  ;;  %129 = vst.msk [vmem:[#allocation3] sm:$0x3] %vm55_vm0, %v127_v16  ;;  %v281_v11 = vsub.f32 %v1471_v26, %v280_v6  ;;  %v275_v12 = vand.u32 4294901760, %v274_v9  ;;  %v287_v13 = vand.u32 4294901760, %v1473_v27 }
  0xe7   :  { %v329_v61 = vand.u32 4294901760, %v1521_v47  ;;  %v336_v63 = vand.u32 4294901760, %v1526_v52  ;;  %v1176_v1 = vpack.c.bf16 %v324_v60, %v317_v53  ;;  %v1188_v49 = vpack.c.bf16 %v1467_v24, %v1465_v23 }
  0xe8   :  { %109 = vst [vmem:[#allocation2] sm:$0x3] %v108_v18  ;;  %v282_v2 = vand.u32 4294901760, %v281_v11  ;;  %v1571_v16 = vpack.c.bf16 %v294_v14, %v287_v13  ;;  %v288_v17 = vsub.f32 %v1473_v27, %v287_v13  ;;  %v295_v18 = vsub.f32 %v1479_v29, %v294_v14 }
  0xe9   :  { %v1251_v3 = vpack.c.bf16 %v336_v63, %v329_v61  ;;  %v330_v4 = vsub.f32 %v1521_v47, %v329_v61  ;;  %v337_v0 = vsub.f32 %v1526_v52, %v336_v63  ;;  %v343_v11 = vand.u32 4294901760, %v1529_v54 }
  0xea   :  { %v1569_v15 = vpack.c.bf16 %v282_v2, %v275_v12  ;;  %v289_v19 = vand.u32 4294901760, %v288_v17  ;;  %v296_v20 = vand.u32 4294901760, %v295_v18  ;;  %v350_v12 = vand.u32 4294901760, %v1531_v55 }
  0xeb   :  { %v331_v6 = vand.u32 4294901760, %v330_v4  ;;  %v338_v9 = vand.u32 4294901760, %v337_v0  ;;  %v344_v14 = vsub.f32 %v1529_v54, %v343_v11  ;;  %v1191_v50 = vpack.c.bf16 %v1471_v26, %v1469_v25  ;;  %v826_v25 = vld [vmem:[%s1725_s4] ss:$0 sm:$0xff] }
  0xec   :  { %v1577_v31 = vpack.c.bf16 %v296_v20, %v289_v19  ;;  %v1254_v13 = vpack.c.bf16 %v350_v12, %v343_v11  ;;  %v351_v17 = vsub.f32 %v1531_v55, %v350_v12  ;;  %v357_v20 = vand.u32 4294901760, %v1533_v56 }
  0xed   :  { %v134_v21 = vld [vmem:[#allocation3] sm:$0x3]  ;;  %v1179_v2 = vpack.c.bf16 %v338_v9, %v331_v6  ;;  %v345_v18 = vand.u32 4294901760, %v344_v14  ;;  %v1194_v53 = vpack.c.bf16 %v1479_v29, %v1473_v27  ;;  %v1197_v60 = vpack.c.bf16 %v1485_v33, %v1483_v32 }
  0xee   :  { %137 = vperm.xlu1 %1302, %v134_v21   ;;  %v301_v21 = vand.u32 4294901760, %v1483_v32  ;;  %v352_v19 = vand.u32 4294901760, %v351_v17  ;;  %v358_v38 = vsub.f32 %v1533_v56, %v357_v20  ;;  %v1200_v61 = vpack.c.bf16 %v1513_v41, %v1511_v40 }
  0xef   :  { %v1203_v63 = vpack.c.bf16 %v1526_v52, %v1521_v47  ;;  %v1206_v4 = vpack.c.bf16 %v1531_v55, %v1529_v54  ;;  %v1209_v23 = vpack.c.bf16 %v1535_v57, %v1533_v56  ;;  %v133_v6 = vld [vmem:[#allocation2] sm:$0x3] }
  0xf0   :  { %v1579_v36 = vpack.c.bf16 %v308_v30, %v301_v21  ;;  %v302_v37 = vsub.f32 %v1483_v32, %v301_v21  ;;  %v364_v21 = vand.u32 4294901760, %v1535_v57  ;;  %v1182_v30 = vpack.c.bf16 %v352_v19, %v345_v18 }
  0xf2   :  { %v303_v42 = vand.u32 4294901760, %v302_v37  ;;  %v1257_v37 = vpack.c.bf16 %v364_v21, %v357_v20 }
  0xf4   :  { %v1585_v46 = vpack.c.bf16 %v310_v43, %v303_v42  ;;  %v365_v42 = vsub.f32 %v1535_v57, %v364_v21  ;;  %v359_v43 = vand.u32 4294901760, %v358_v38 }
  0xf6   :  { %v366_v44 = vand.u32 4294901760, %v365_v42 }
  0xf8   :  { %v1185_v45 = vpack.c.bf16 %v366_v44, %v359_v43 }
 0x16d   :  { %v138_v24 = vpop.permute.xlu1 %137 }
 0x16e   :  { %1312 = vrcp.f32 %v138_v24 }
 0x178   :  { %v1313_v0 = vpop.eup %1312 }
 0x179   :  { %v141_v9 = vmul.f32 %v1313_v0, %v133_v6 }
 0x17b   :  { %v1619_v11 = vand.u32 4294901760, %v141_v9 }
 0x17d   :  { %v1622_v12 = vsub.f32 %v141_v9, %v1619_v11 }
 0x17f   :  { %v248_v14 = vand.u32 4294901760, %v1622_v12 }
 0x181   :  { %1067 = vmatmul.mubr.f32.vlgmr.msra.gmra.mrb[0].mxu0 %v248_v14  ;;  %v249_v17 = vsub.f32 %v1622_v12, %v248_v14 }
 0x182   :  { %1237 = vmatpush3.bf16.msra.mxu0 %v1555_v62  ;;  %1101 = vmatprep.mubr.msk.f32.mxu0 %vm1393_vm2, %v1390_v5 }
 0x183   :  { %1238 = vmatprep.subr.bf16.mxu0 %v1392_v10  ;;  %v250_v18 = vand.u32 4294901760, %v249_v17 }
 0x185   :  { %962 = vmatmul.mubr.f32.vlgmr.msra.gmra.mrb[0].mxu1 %v250_v18 }
 0x186   :  { %1165 = vmatpush3.bf16.msra.mxu1 %v1561_v7  ;;  %1240 = vmatpush3.bf16.msra.mxu0 %v1563_v8 }
 0x187   :  { %1166 = vmatprep.subr.bf16.mxu1 %v1392_v10  ;;  %1241 = vmatprep.subr.bf16.mxu0 %v1392_v10 }
 0x188   :  { %996 = vmatprep.mubr.msk.f32.mxu1 %vm1393_vm2, %v1390_v5 }
 0x18a   :  { %1168 = vmatpush3.bf16.msra.mxu1 %v1569_v15  ;;  %1243 = vmatpush3.bf16.msra.mxu0 %v1571_v16 }
 0x18b   :  { %1169 = vmatprep.subr.bf16.mxu1 %v1392_v10  ;;  %1244 = vmatprep.subr.bf16.mxu0 %v1392_v10 }
 0x18e   :  { %1171 = vmatpush3.bf16.msra.mxu1 %v1577_v31  ;;  %1246 = vmatpush3.bf16.msra.mxu0 %v1579_v36 }
 0x18f   :  { %1172 = vmatprep.subr.bf16.mxu1 %v1392_v10  ;;  %1247 = vmatprep.subr.bf16.mxu0 %v1392_v10 }
 0x192   :  { %1174 = vmatpush3.bf16.msra.mxu1 %v1585_v46  ;;  %1249 = vmatpush3.bf16.msra.mxu0 %v1587_v48 }
 0x193   :  { %1175 = vmatprep.subr.bf16.mxu1 %v1392_v10  ;;  %1250 = vmatprep.subr.bf16.mxu0 %v1392_v10 }
 0x196   :  { %1177 = vmatpush3.bf16.msra.mxu1 %v1176_v1  ;;  %1252 = vmatpush3.bf16.msra.mxu0 %v1251_v3 }
 0x197   :  { %1178 = vmatprep.subr.bf16.mxu1 %v1392_v10  ;;  %1253 = vmatprep.subr.bf16.mxu0 %v1392_v10 }
 0x19a   :  { %1180 = vmatpush3.bf16.msra.mxu1 %v1179_v2  ;;  %1255 = vmatpush3.bf16.msra.mxu0 %v1254_v13 }
 0x19b   :  { %1181 = vmatprep.subr.bf16.mxu1 %v1392_v10  ;;  %1256 = vmatprep.subr.bf16.mxu0 %v1392_v10 }
 0x19e   :  { %1183 = vmatpush3.bf16.msra.mxu1 %v1182_v30  ;;  %1258 = vmatpush3.bf16.msra.mxu0 %v1257_v37 }
 0x19f   :  { %1184 = vmatprep.subr.bf16.mxu1 %v1392_v10  ;;  %1259 = vmatprep.subr.bf16.mxu0 %v1392_v10 }
 0x1a1   :  { %1102 = vmatmul.mubr.f32.vlgmr.msra.gmra.mrb[0].mxu0 %v1619_v11 }
 0x1a2   :  { %1186 = vmatpush3.bf16.msra.mxu1 %v1185_v45  ;;  %1261 = vmatpush3.bf16.msra.mxu0 %v1463_v22 }
 0x1a3   :  { %1187 = vmatprep.subr.bf16.mxu1 %v1392_v10  ;;  %1262 = vmatprep.subr.bf16.mxu0 %v1392_v10 }
 0x1a4   :  { %1136 = vmatprep.mubr.msk.f32.mxu0 %vm1393_vm2, %v1390_v5 }
 0x1a5   :  { %997 = vmatmul.mubr.f32.vlgmr.msra.gmra.mrb[0].mxu1 %v1619_v11 }
 0x1a6   :  { %1189 = vmatpush3.bf16.msra.mxu1 %v1188_v49  ;;  %1264 = vmatpush3.bf16.msra.mxu0 %v1477_v28 }
 0x1a7   :  { %1190 = vmatprep.subr.bf16.mxu1 %v1392_v10  ;;  %1265 = vmatprep.subr.bf16.mxu0 %v1392_v10 }
 0x1a8   :  { %1031 = vmatprep.mubr.msk.f32.mxu1 %vm1393_vm2, %v1390_v5 }
 0x1aa   :  { %1192 = vmatpush3.bf16.msra.mxu1 %v1191_v50  ;;  %1267 = vmatpush3.bf16.msra.mxu0 %v1489_v34 }
 0x1ab   :  { %1193 = vmatprep.subr.bf16.mxu1 %v1392_v10  ;;  %1268 = vmatprep.subr.bf16.mxu0 %v1392_v10 }
 0x1ae   :  { %1195 = vmatpush3.bf16.msra.mxu1 %v1194_v53  ;;  %1270 = vmatpush3.bf16.msra.mxu0 %v1495_v35 }
 0x1af   :  { %1196 = vmatprep.subr.bf16.mxu1 %v1392_v10  ;;  %1271 = vmatprep.subr.bf16.mxu0 %v1392_v10 }
 0x1b2   :  { %1198 = vmatpush3.bf16.msra.mxu1 %v1197_v60  ;;  %1273 = vmatpush3.bf16.msra.mxu0 %v1509_v39 }
 0x1b3   :  { %1199 = vmatprep.subr.bf16.mxu1 %v1392_v10  ;;  %1274 = vmatprep.subr.bf16.mxu0 %v1392_v10 }
 0x1b6   :  { %1201 = vmatpush3.bf16.msra.mxu1 %v1200_v61  ;;  %1276 = vmatpush3.bf16.msra.mxu0 %v1524_v51 }
 0x1b7   :  { %1202 = vmatprep.subr.bf16.mxu1 %v1392_v10  ;;  %1277 = vmatprep.subr.bf16.mxu0 %v1392_v10 }
 0x1ba   :  { %1204 = vmatpush3.bf16.msra.mxu1 %v1203_v63  ;;  %1279 = vmatpush3.bf16.msra.mxu0 %v1539_v58 }
 0x1bb   :  { %1205 = vmatprep.subr.bf16.mxu1 %v1392_v10  ;;  %1280 = vmatprep.subr.bf16.mxu0 %v1392_v10 }
 0x1be   :  { %1207 = vmatpush3.bf16.msra.mxu1 %v1206_v4  ;;  %1282 = vmatpush3.bf16.msra.mxu0 %v1545_v59 }
 0x1bf   :  { %1208 = vmatprep.subr.bf16.mxu1 %v1392_v10 }
 0x1c1   :  { %1137 = vmatmul.mubr.f32.vlgmr.msra.gmra.mrb[0].mxu0 %v1619_v11 }
 0x1c2   :  { %1210 = vmatpush3.bf16.msra.mxu1 %v1209_v23 }
 0x1c5   :  { %1032 = vmatmul.mubr.f32.vlgmr.msra.gmra.mrb[0].mxu1 %v1622_v12 }
 0x294   :  { %v802_v5 = vpop.f32.mrb[0].mxu0 }
 0x295   :  { %v1138_v22 = vpop.f32.mrb[1].mxu0 }
 0x298   :  { %v507_v26 = vpop.f32.mrb[0].mxu1 }
 0x299   :  { %v1283_v27 = vadd.f32 %v826_v25, %v507_v26  ;;  %v1033_v28 = vpop.f32.mrb[1].mxu1 }
 0x29b   :  { %v1284_v10 = vadd.f32 %v1283_v27, %v802_v5 }
 0x29d   :  { %806 = vst [vmem:[#allocation10] sm:$0x3] %v1284_v10 }
 0x29e   :  { %1369 = shalt.err (!%p1366_p6)
}
 0x29f   :  { %s1370_s26 = scalar_lea.hbm %s1726_s5, 32 }
 0x2a0   :  { %p1371_p7 = scmp.ne.s32.totalorder %s1726_s5, %s1370_s26  ;;  %p1374_p8 = scmp.lt.u32.totalorder %s1370_s26, %s1726_s5 }
 0x2a2   :  { %p1376_p9 = pnand %p1374_p8, %p1371_p7 }
 0x2a4   :  { %1379 = shalt.err (!%p1376_p9)
}
 0x2a5   :  { %816 = dma.vmem_to_hbm [thread:$0]  %s814_s22, 32, %s1726_s5, [#allocation7]  }
 0x2a6   :  { %1384 = dma.done.wait [#allocation7], 32  }
 0x2a7   :  { %1385 = vsyncadd [#allocation7], 4294967264 }
 0x2a8   :  { %820 = vsyncpa [#allocation6], 1 }
 0x2a9   :  { %821 = vsyncpa [#allocation9], 1 }
 0x2aa   :  { %822 = vsyncpa [#allocation7], 1 }

</bundles_post_ra>
